<compile_context>
chip_gen: v7x
topology: tpu7x:2x2x1
jax: 0.10.0
libtpu: 0.0.40
codegen_flags: <defaults>
</compile_context>

<pallas_src>
import functools

import jax
import jax.numpy as jnp
from jax.experimental import pallas as pl
from jax.experimental.pallas import tpu as pltpu

LANE = 128
# v6e/v7x VPUs execute packed bf16 (2 elems/lane) -> bias+ReLU epilogue in bf16.
# Set to False on v5e (no bf16 VPU).
BF16_EPILOGUE = True


def _round_up(x, m):
    return ((x + m - 1) // m) * m


def _layer(h_bf16, w_ref, b_ref):
    # Linear with BN pre-folded into (w, b); bf16 MXU matmul, f32 accumulation.
    z = jnp.dot(h_bf16, w_ref[...], preferred_element_type=jnp.float32)
    if BF16_EPILOGUE:
        z = z.astype(jnp.bfloat16) + b_ref[...]
        return jnp.maximum(z, 0.0)
    z = z + b_ref[...].astype(jnp.float32)
    return jnp.maximum(z, 0.0).astype(jnp.bfloat16)


def mlp_kernel(f_ref, w1_ref, b1_ref, w2_ref, b2_ref, w3_ref, b3_ref, msg_ref):
    # f_ref   : [tE, Fp] bf16 edge features cat([x_i, x_j - x_i]) (lane-padded)
    # msg_ref : [tE, Hp] bf16 per-edge messages (lane `hidden` == 1 if deg-lane)
    h = _layer(f_ref[...], w1_ref, b1_ref)
    h = _layer(h, w2_ref, b2_ref)
    h = _layer(h, w3_ref, b3_ref)
    msg_ref[...] = h


def scatter_mean_kernel(dst_ref, msg_ref, out_ref, deg_ref, *, deg_lane):
    # dst_ref : [1, tE]  int32 target node per edge (-1 on padded edges)
    # msg_ref : [tE, Hp] bf16 messages
    # out_ref : [tN, Hp] f32 resident accumulator / final mean-aggregated output
    # deg_ref : [tN, 1]  f32 degree scratch (used only when deg_lane < 0)
    n = pl.program_id(0)
    k = pl.program_id(1)
    tN = out_ref.shape[0]
    tE = dst_ref.shape[1]

    @pl.when(k == 0)
    def _():
        out_ref[...] = jnp.zeros_like(out_ref)
        if deg_lane < 0:
            deg_ref[...] = jnp.zeros_like(deg_ref)

    # Per-tile one-hot scatter matrix, built in-register from dst indices.
    node_ids = n * tN + jax.lax.broadcasted_iota(jnp.int32, (tN, tE), 0)
    match = node_ids == dst_ref[...]                         # [tN, tE]
    a = match.astype(jnp.bfloat16)
    out_ref[...] += jnp.dot(a, msg_ref[...], preferred_element_type=jnp.float32)
    if deg_lane < 0:
        # No spare lane (hidden % 128 == 0): XLU row-sum, hidden under MXU work.
        deg_ref[...] += jnp.sum(a.astype(jnp.float32), axis=1, keepdims=True)

    @pl.when(k == pl.num_programs(1) - 1)
    def _():
        acc = out_ref[...]
        if deg_lane >= 0:
            deg = acc[:, deg_lane:deg_lane + 1]              # [tN, 1] in-degree
        else:
            deg = deg_ref[...]
        inv = 1.0 / jnp.maximum(deg, 1.0)                    # exact (runs once)
        out_ref[...] = acc * inv                             # 'mean' aggregation


def init_params(key, input_dim, hidden_dim, eps=1e-5):
    """Deterministic synthetic parameters (Linear W,b + BN gamma,beta,mean,var)."""
    dims = [(2 * input_dim, hidden_dim),
            (hidden_dim, hidden_dim),
            (hidden_dim, hidden_dim)]
    params = {}
    for l, (din, dout) in enumerate(dims, start=1):
        key, kw, kb = jax.random.split(key, 3)
        w = jax.random.normal(kw, (din, dout), jnp.float32) * 0.1
        b = jax.random.normal(kb, (dout,), jnp.float32) * 0.1
        gamma = 1.0 + 0.01 * jnp.arange(dout, dtype=jnp.float32)
        beta = 0.02 * jnp.arange(dout, dtype=jnp.float32)
        run_mean = jnp.zeros((dout,), jnp.float32)
        run_var = jnp.ones((dout,), jnp.float32)
        scale = gamma / jnp.sqrt(run_var + eps)
        shift = beta - run_mean * scale
        params[f"w{l}"] = w
        params[f"b{l}"] = b.reshape(1, dout)
        params[f"s{l}"] = scale.reshape(1, dout)
        params[f"t{l}"] = shift.reshape(1, dout)
    return params


def edge_conv_block(X, edge_index, params, skip=False):
    """JAX wrapper mirroring EdgeConvBlock.forward(X, edge_index)."""
    N, d_in = X.shape
    hidden = params["w1"].shape[1]
    src = edge_index[0]                     # x_j source nodes
    dst = edge_index[1]                     # x_i target nodes (aggregation idx)
    E = src.shape[0]

    # Edge features cat([x_i, x_j - x_i]); gather stays in XLA (see TODO above).
    x_i = X[dst]
    x_j = X[src]
    F = jnp.concatenate([x_i, x_j - x_i], axis=-1)           # [E, 2*d_in]

    # ---- padding / tiling ----
    Fin = 2 * d_in
    Fp = _round_up(Fin, LANE)
    Hp = _round_up(hidden, LANE)
    use_deg_lane = Hp > hidden              # spare lane available for the degree
    deg_lane = hidden if use_deg_lane else -1

    # Big edge tiles amortize the ~0.35us/step pipeline overhead.
    tE = min(2048, _round_up(max(E, 1), LANE))
    E_pad = _round_up(max(E, 1), tE)
    N_pad = _round_up(max(N, 1), 8)
    tN = min(256, N_pad)                    # parallel node axis (>=2 tiles when big)
    N_pad = _round_up(N_pad, tN)

    F_pad = jnp.zeros((E_pad, Fp), jnp.bfloat16).at[:E, :Fin].set(
        F.astype(jnp.bfloat16))
    # Padded edges get dst = -1 -> match no node -> zero sum and zero degree.
    dst_pad = jnp.full((1, E_pad), -1, jnp.int32).at[0, :E].set(
        dst.astype(jnp.int32))

    # Fold BatchNorm into the Linear and zero-pad to (din_p, Hp) / (1, Hp).
    def fold_pad(l, din_p, deg_bias=False):
        w = params[f"w{l}"]
        b = params[f"b{l}"].reshape(-1)
        s = params[f"s{l}"].reshape(-1)
        t = params[f"t{l}"].reshape(-1)
        w_f = w * s[None, :]
        b_f = b * s + t
        din, dout = w.shape
        wp = jnp.zeros((din_p, Hp), jnp.float32).at[:din, :dout].set(w_f)
        bp = jnp.zeros((1, Hp), jnp.float32).at[0, :dout].set(b_f)
        if deg_bias:
            # ReLU(h @ 0 + 1) = 1 on every edge row -> degree falls out of the
            # scatter matmul for free (w3 column `hidden` stays zero).
            bp = bp.at[0, deg_lane].set(1.0)
        return wp.astype(jnp.bfloat16), bp.astype(jnp.bfloat16)

    w1p, b1p = fold_pad(1, Fp)
    w2p, b2p = fold_pad(2, Hp)
    w3p, b3p = fold_pad(3, Hp, deg_bias=use_deg_lane)

    const = lambda *_: (0, 0)

    # ---- pass 1: per-edge 3-layer MLP (grid over edge tiles only) ----
    vmem1 = (2 * tE * (Fp + Hp) * 2                 # double-buffered F in / msg out
             + (Fp + 2 * Hp) * Hp * 2 + 3 * Hp * 2  # resident folded weights/biases
             + 4 * tE * Hp * 4)                     # transient f32 activations
    vmem1 = int(min(max(2 * vmem1, 16 << 20), 40 << 20))
    msg = pl.pallas_call(
        mlp_kernel,
        out_shape=jax.ShapeDtypeStruct((E_pad, Hp), jnp.bfloat16),
        grid_spec=pltpu.PrefetchScalarGridSpec(
            num_scalar_prefetch=0,
            grid=(E_pad // tE,),
            in_specs=[pl.BlockSpec((tE, Fp), lambda e: (e, 0)),
                      pl.BlockSpec((Fp, Hp), const), pl.BlockSpec((1, Hp), const),
                      pl.BlockSpec((Hp, Hp), const), pl.BlockSpec((1, Hp), const),
                      pl.BlockSpec((Hp, Hp), const), pl.BlockSpec((1, Hp), const)],
            out_specs=pl.BlockSpec((tE, Hp), lambda e: (e, 0))),
        compiler_params=pltpu.CompilerParams(
            dimension_semantics=("parallel",),
            vmem_limit_bytes=vmem1),
    )(F_pad, w1p, b1p, w2p, b2p, w3p, b3p)

    # ---- pass 2: one-hot scatter-sum on MXU + mean normalization ----
    vmem2 = (2 * tE * 4                    # dst tiles (int32)
             + 2 * tE * Hp * 2             # message tiles (bf16)
             + 2 * tN * Hp * 4             # resident output accumulator
             + tN * LANE * 4               # degree scratch (lane padded)
             + tN * tE * 10)               # transient iota/compare/one-hot
    vmem2 = int(min(max(2 * vmem2, 16 << 20), 40 << 20))
    kernel = functools.partial(scatter_mean_kernel, deg_lane=deg_lane)
    H_out = pl.pallas_call(
        kernel,
        out_shape=jax.ShapeDtypeStruct((N_pad, Hp), jnp.float32),
        grid_spec=pltpu.PrefetchScalarGridSpec(
            num_scalar_prefetch=0,
            grid=(N_pad // tN, E_pad // tE),
            in_specs=[pl.BlockSpec((1, tE), lambda n, k: (0, k)),
                      pl.BlockSpec((tE, Hp), lambda n, k: (k, 0))],
            out_specs=pl.BlockSpec((tN, Hp), lambda n, k: (n, 0)),
            scratch_shapes=[pltpu.VMEM((tN, 1), jnp.float32)]),
        compiler_params=pltpu.CompilerParams(
            dimension_semantics=("parallel", "arbitrary"),
            vmem_limit_bytes=vmem2),
    )(dst_pad, msg)

    H = H_out[:N, :hidden]
    if skip:
        return jnp.hstack((H, X))
    return H


def reference(X, edge_index, params):
    """Pure-JAX f32 reference of the same forward pass (for correctness check)."""
    src, dst = edge_index[0], edge_index[1]
    x_i, x_j = X[dst], X[src]
    h = jnp.concatenate([x_i, x_j - x_i], axis=-1)
    for l in (1, 2, 3):
        h = h @ params[f"w{l}"] + params[f"b{l}"]
        h = h * params[f"s{l}"] + params[f"t{l}"]
        h = jnp.maximum(h, 0.0)
    N = X.shape[0]
    A = (dst[None, :] == jnp.arange(N)[:, None]).astype(jnp.float32)
    deg = jnp.maximum(A.sum(1, keepdims=True), 1.0)
    return (A @ h) / deg


if __name__ == "__main__":
    N, D_IN, HIDDEN, E = 16, 4, 32, 64

    key = jax.random.PRNGKey(0)
    kx, ke, kp = jax.random.split(key, 3)
    X = jax.random.normal(kx, (N, D_IN), dtype=jnp.float32)
    edge_index = jax.random.randint(ke, (2, E), 0, N, dtype=jnp.int32)
    params = init_params(kp, D_IN, HIDDEN)

    out = edge_conv_block(X, edge_index, params, skip=False)
    out = jax.block_until_ready(out)

    ref = reference(X, edge_index, params)
    assert out.shape == (N, HIDDEN), out.shape
    # bf16 MXU matmuls / bf16 messages -> looser tolerance than the f32 ref.
    assert bool(jnp.allclose(out, ref, atol=2e-2, rtol=2e-2)), "mismatch vs reference"
    print("KERNEL_OK")
</pallas_src>

<mosaic_0001>
module attributes {stable_mosaic.version = 11 : i64} {
  func.func @mlp_kernel(%arg0: i32, %arg1: memref<128x128xbf16, #tpu.memory_space<vmem>>, %arg2: memref<128x128xbf16, #tpu.memory_space<vmem>>, %arg3: memref<1x128xbf16, #tpu.memory_space<vmem>>, %arg4: memref<128x128xbf16, #tpu.memory_space<vmem>>, %arg5: memref<1x128xbf16, #tpu.memory_space<vmem>>, %arg6: memref<128x128xbf16, #tpu.memory_space<vmem>>, %arg7: memref<1x128xbf16, #tpu.memory_space<vmem>>, %arg8: memref<128x128xbf16, #tpu.memory_space<vmem>>) attributes {dimension_semantics = [#tpu.dimension_semantics<parallel>], iteration_bounds = array<i64: 1>, scalar_prefetch = 0 : i64, scratch_operands = 0 : i64, tpu.core_type = #tpu.core_type<tc>, window_params = [{transform_indices = @transform_0, window_bounds = array<i64: 128, 128>}, {pipeline_mode = #tpu.pipeline_mode<synchronous>, transform_indices = @transform_1, window_bounds = array<i64: 128, 128>}, {pipeline_mode = #tpu.pipeline_mode<synchronous>, transform_indices = @transform_2, window_bounds = array<i64: 1, 128>}, {pipeline_mode = #tpu.pipeline_mode<synchronous>, transform_indices = @transform_3, window_bounds = array<i64: 128, 128>}, {pipeline_mode = #tpu.pipeline_mode<synchronous>, transform_indices = @transform_4, window_bounds = array<i64: 1, 128>}, {pipeline_mode = #tpu.pipeline_mode<synchronous>, transform_indices = @transform_5, window_bounds = array<i64: 128, 128>}, {pipeline_mode = #tpu.pipeline_mode<synchronous>, transform_indices = @transform_6, window_bounds = array<i64: 1, 128>}, {transform_indices = @transform_7, window_bounds = array<i64: 128, 128>}]} {
    %c0 = arith.constant 0 : index
    %c0_0 = arith.constant 0 : index
    %0 = vector.load %arg1[%c0, %c0_0] : memref<128x128xbf16, #tpu.memory_space<vmem>>, vector<128x128xbf16>
    %c0_1 = arith.constant 0 : index
    %c0_2 = arith.constant 0 : index
    %1 = vector.load %arg2[%c0_1, %c0_2] : memref<128x128xbf16, #tpu.memory_space<vmem>>, vector<128x128xbf16>
    %cst = arith.constant dense<0.000000e+00> : vector<128x128xf32>
    %2 = tpu.matmul %0, %1, %cst {dimension_numbers = #tpu.dot_dimension_numbers<[1], [0], [0], [1], [0, 0, 1, 1], [], []>} : vector<128x128xbf16>, vector<128x128xbf16>, vector<128x128xf32> -> vector<128x128xf32>
    %3 = arith.truncf %2 : vector<128x128xf32> to vector<128x128xbf16>
    %c0_3 = arith.constant 0 : index
    %c0_4 = arith.constant 0 : index
    %4 = vector.load %arg3[%c0_3, %c0_4] : memref<1x128xbf16, #tpu.memory_space<vmem>>, vector<1x128xbf16>
    %5 = vector.broadcast %4 : vector<1x128xbf16> to vector<128x128xbf16>
    %6 = arith.addf %3, %5 : vector<128x128xbf16>
    %cst_5 = arith.constant 0.000000e+00 : bf16
    %7 = vector.broadcast %cst_5 : bf16 to vector<128x128xbf16>
    %8 = arith.maximumf %6, %7 : vector<128x128xbf16>
    %c0_6 = arith.constant 0 : index
    %c0_7 = arith.constant 0 : index
    %9 = vector.load %arg4[%c0_6, %c0_7] : memref<128x128xbf16, #tpu.memory_space<vmem>>, vector<128x128xbf16>
    %cst_8 = arith.constant dense<0.000000e+00> : vector<128x128xf32>
    %10 = tpu.matmul %8, %9, %cst_8 {dimension_numbers = #tpu.dot_dimension_numbers<[1], [0], [0], [1], [0, 0, 1, 1], [], []>} : vector<128x128xbf16>, vector<128x128xbf16>, vector<128x128xf32> -> vector<128x128xf32>
    %11 = arith.truncf %10 : vector<128x128xf32> to vector<128x128xbf16>
    %c0_9 = arith.constant 0 : index
    %c0_10 = arith.constant 0 : index
    %12 = vector.load %arg5[%c0_9, %c0_10] : memref<1x128xbf16, #tpu.memory_space<vmem>>, vector<1x128xbf16>
    %13 = vector.broadcast %12 : vector<1x128xbf16> to vector<128x128xbf16>
    %14 = arith.addf %11, %13 : vector<128x128xbf16>
    %cst_11 = arith.constant 0.000000e+00 : bf16
    %15 = vector.broadcast %cst_11 : bf16 to vector<128x128xbf16>
    %16 = arith.maximumf %14, %15 : vector<128x128xbf16>
    %c0_12 = arith.constant 0 : index
    %c0_13 = arith.constant 0 : index
    %17 = vector.load %arg6[%c0_12, %c0_13] : memref<128x128xbf16, #tpu.memory_space<vmem>>, vector<128x128xbf16>
    %cst_14 = arith.constant dense<0.000000e+00> : vector<128x128xf32>
    %18 = tpu.matmul %16, %17, %cst_14 {dimension_numbers = #tpu.dot_dimension_numbers<[1], [0], [0], [1], [0, 0, 1, 1], [], []>} : vector<128x128xbf16>, vector<128x128xbf16>, vector<128x128xf32> -> vector<128x128xf32>
    %19 = arith.truncf %18 : vector<128x128xf32> to vector<128x128xbf16>
    %c0_15 = arith.constant 0 : index
    %c0_16 = arith.constant 0 : index
    %20 = vector.load %arg7[%c0_15, %c0_16] : memref<1x128xbf16, #tpu.memory_space<vmem>>, vector<1x128xbf16>
    %21 = vector.broadcast %20 : vector<1x128xbf16> to vector<128x128xbf16>
    %22 = arith.addf %19, %21 : vector<128x128xbf16>
    %cst_17 = arith.constant 0.000000e+00 : bf16
    %23 = vector.broadcast %cst_17 : bf16 to vector<128x128xbf16>
    %24 = arith.maximumf %22, %23 : vector<128x128xbf16>
    %c0_18 = arith.constant 0 : index
    %c0_19 = arith.constant 0 : index
    %25 = vector.load %arg8[%c0_18, %c0_19] : memref<128x128xbf16, #tpu.memory_space<vmem>>, vector<128x128xbf16>
    tpu.vector_store %arg8[%c0_18, %c0_19], %24 {strides = array<i32>} : memref<128x128xbf16, #tpu.memory_space<vmem>>, vector<128x128xbf16>,
    return
  }
  func.func @transform_0(%arg0: i32) -> (i32, i32) {
    %c0_i32 = arith.constant 0 : i32
    %c0_i32_0 = arith.constant 0 : i32
    return %arg0, %c0_i32 : i32, i32
  }
  func.func @transform_1(%arg0: i32) -> (i32, i32) {
    %c0_i32 = arith.constant 0 : i32
    %c0_i32_0 = arith.constant 0 : i32
    %c0_i32_1 = arith.constant 0 : i32
    return %c0_i32, %c0_i32_0 : i32, i32
  }
  func.func @transform_2(%arg0: i32) -> (i32, i32) {
    %c0_i32 = arith.constant 0 : i32
    %c0_i32_0 = arith.constant 0 : i32
    %c0_i32_1 = arith.constant 0 : i32
    return %c0_i32, %c0_i32_0 : i32, i32
  }
  func.func @transform_3(%arg0: i32) -> (i32, i32) {
    %c0_i32 = arith.constant 0 : i32
    %c0_i32_0 = arith.constant 0 : i32
    %c0_i32_1 = arith.constant 0 : i32
    return %c0_i32, %c0_i32_0 : i32, i32
  }
  func.func @transform_4(%arg0: i32) -> (i32, i32) {
    %c0_i32 = arith.constant 0 : i32
    %c0_i32_0 = arith.constant 0 : i32
    %c0_i32_1 = arith.constant 0 : i32
    return %c0_i32, %c0_i32_0 : i32, i32
  }
  func.func @transform_5(%arg0: i32) -> (i32, i32) {
    %c0_i32 = arith.constant 0 : i32
    %c0_i32_0 = arith.constant 0 : i32
    %c0_i32_1 = arith.constant 0 : i32
    return %c0_i32, %c0_i32_0 : i32, i32
  }
  func.func @transform_6(%arg0: i32) -> (i32, i32) {
    %c0_i32 = arith.constant 0 : i32
    %c0_i32_0 = arith.constant 0 : i32
    %c0_i32_1 = arith.constant 0 : i32
    return %c0_i32, %c0_i32_0 : i32, i32
  }
  func.func @transform_7(%arg0: i32) -> (i32, i32) {
    %c0_i32 = arith.constant 0 : i32
    %c0_i32_0 = arith.constant 0 : i32
    return %arg0, %c0_i32 : i32, i32
  }
}

</mosaic_0001>

<bundles_post_ra>
// kernel: tpu_custom_call.1
= control target key start
LH: loop header
LB: loop body
LE: loop exit
PB: predicated region body
PF: predicated region fallthrough
CT: control target
= control target key end

     0   :  { %12 = vsyncpa [#allocation3], 0  ;;  %s1370_s0 = inlined_call_operand.hbm [shape: bf16[128,128], index: 0, kind: input, shape index: {}]   ;;  %s1371_s1 = inlined_call_operand.hbm [shape: bf16[128,128], index: 1, kind: input, shape index: {}]   ;;  %s1372_s2 = inlined_call_operand.vmem [shape: bf16[1,128], index: 2, kind: input, shape index: {}]   ;;  %s1373_s3 = inlined_call_operand.hbm [shape: bf16[128,128], index: 3, kind: input, shape index: {}]   ;;  %s1374_s4 = inlined_call_operand.vmem [shape: bf16[1,128], index: 4, kind: input, shape index: {}]   ;;  %s1375_s5 = inlined_call_operand.hbm [shape: bf16[128,128], index: 5, kind: input, shape index: {}]   ;;  %s1376_s6 = inlined_call_operand.vmem [shape: bf16[1,128], index: 6, kind: input, shape index: {}]   ;;  %s1377_s7 = inlined_call_operand.hbm [shape: bf16[128,128], index: 7, kind: output, shape index: {}]  }
   0x1   :  { %13 = vsyncpa [#allocation6], 0 }
   0x2   :  { %14 = vsyncpa [#allocation9], 0 }
   0x3   :  { %15 = vsyncpa [#allocation4], 0  ;;  %s1183_s24 = smov [#allocation5]   ;;  %s1184_s26 = smov [#allocation2]  }
   0x4   :  { %s33_s25 = sshll.u32 %s1183_s24, 4  ;;  %s21_s27 = sshll.u32 %s1184_s26, 4  ;;  %s34_s25 = int_to_ptr.vmem [resolvable:$true] %s33_s25  ;;  %s1231_s27 = int_to_ptr.vmem [resolvable:$true] %s21_s27 }
   0x5   :  { %s1065_s30 = scalar_lea.hbm %s1371_s1, 1024 }
   0x6   :  { %p1066_p0 = scmp.ne.s32.totalorder %s1371_s1, %s1065_s30  ;;  %p1069_p1 = scmp.lt.u32.totalorder %s1065_s30, %s1371_s1 }
   0x8   :  { %p1071_p2 = pnand %p1069_p1, %p1066_p0 }
   0xa   :  { %1074 = shalt.err (!%p1071_p2)
}
   0xb   :  { %s1075_s12 = scalar_lea.vmem %s34_s25, 1024  ;;  %p1080_p4 = scmp.lt.s32.totalorder %s34_s25, %s34_s25 }
   0xc   :  { %p1076_p3 = scmp.ne.s32.totalorder %s34_s25, %s1075_s12  ;;  %p1081_p5 = scmp.lt.s32.totalorder %s1075_s12, %s1075_s12 }
   0xe   :  { %p1082_p6 = por %p1081_p5, %p1080_p4 }
  0x10   :  { %p1083_p7 = pnand %p1082_p6, %p1076_p3 }
  0x12   :  { %1086 = shalt.err (!%p1083_p7)
}
  0x13   :  { %s1185_s13 = smov 64   ;;  %s1186_s14 = smov 4  }
  0x14   :  { %39 = dma.hbm_to_vmem [thread:$0]  %s1371_s1, 1024, %s34_s25, [#allocation6], %s1185_s13, %s1185_s13, %s1186_s14  }
  0x15   :  { %s1087_s19 = scalar_lea.hbm %s1370_s0, 1024 }
  0x16   :  { %p1088_p8 = scmp.ne.s32.totalorder %s1370_s0, %s1087_s19  ;;  %p1091_p9 = scmp.lt.u32.totalorder %s1087_s19, %s1370_s0 }
  0x18   :  { %p1093_p10 = pnand %p1091_p9, %p1088_p8 }
  0x1a   :  { %1096 = shalt.err (!%p1093_p10)
}
  0x1b   :  { %s1097_s24 = scalar_lea.vmem %s1231_s27, 1024  ;;  %p1102_p12 = scmp.lt.s32.totalorder %s1231_s27, %s1231_s27 }
  0x1c   :  { %p1098_p11 = scmp.ne.s32.totalorder %s1231_s27, %s1097_s24  ;;  %p1103_p13 = scmp.lt.s32.totalorder %s1097_s24, %s1097_s24 }
  0x1e   :  { %p1104_p0 = por %p1103_p13, %p1102_p12 }
  0x20   :  { %p1105_p1 = pnand %p1104_p0, %p1098_p11 }
  0x22   :  { %1108 = shalt.err (!%p1105_p1)
}
  0x23   :  { %27 = dma.hbm_to_vmem [thread:$0]  %s1370_s0, 1024, %s1231_s27, [#allocation3], %s1185_s13, %s1185_s13, %s1186_s14  }
  0x24   :  { %s1187_s26 = smov [#allocation7]   ;;  %s1188_s29 = smov [#allocation8]  }
  0x25   :  { %s47_s28 = sshll.u32 %s1187_s26, 4  ;;  %s61_s30 = sshll.u32 %s1188_s29, 4  ;;  %s48_s28 = int_to_ptr.vmem [resolvable:$true] %s47_s28  ;;  %s1268_s30 = int_to_ptr.vmem [resolvable:$true] %s61_s30 }
  0x26   :  { %s1109_s10 = scalar_lea.hbm %s1373_s3, 1024 }
  0x27   :  { %p1110_p2 = scmp.ne.s32.totalorder %s1373_s3, %s1109_s10  ;;  %p1113_p3 = scmp.lt.u32.totalorder %s1109_s10, %s1373_s3 }
  0x29   :  { %p1115_p4 = pnand %p1113_p3, %p1110_p2 }
  0x2b   :  { %1118 = shalt.err (!%p1115_p4)
}
  0x2c   :  { %s1119_s0 = scalar_lea.vmem %s48_s28, 1024  ;;  %p1124_p6 = scmp.lt.s32.totalorder %s48_s28, %s48_s28 }
  0x2d   :  { %p1120_p5 = scmp.ne.s32.totalorder %s48_s28, %s1119_s0  ;;  %p1125_p7 = scmp.lt.s32.totalorder %s1119_s0, %s1119_s0 }
  0x2f   :  { %p1126_p8 = por %p1125_p7, %p1124_p6 }
  0x31   :  { %p1127_p9 = pnand %p1126_p8, %p1120_p5 }
  0x33   :  { %1130 = shalt.err (!%p1127_p9)
}
  0x34   :  { %53 = dma.hbm_to_vmem [thread:$0]  %s1373_s3, 1024, %s48_s28, [#allocation6], %s1185_s13, %s1185_s13, %s1186_s14  }
  0x35   :  { %s1131_s20 = scalar_lea.hbm %s1375_s5, 1024 }
  0x36   :  { %p1132_p10 = scmp.ne.s32.totalorder %s1375_s5, %s1131_s20  ;;  %p1135_p11 = scmp.lt.u32.totalorder %s1131_s20, %s1375_s5 }
  0x38   :  { %p1137_p12 = pnand %p1135_p11, %p1132_p10 }
  0x3a   :  { %1140 = shalt.err (!%p1137_p12)
}
  0x3b   :  { %s1141_s1 = scalar_lea.vmem %s1268_s30, 1024  ;;  %p1146_p0 = scmp.lt.s32.totalorder %s1268_s30, %s1268_s30 }
  0x3c   :  { %p1142_p13 = scmp.ne.s32.totalorder %s1268_s30, %s1141_s1  ;;  %p1147_p1 = scmp.lt.s32.totalorder %s1141_s1, %s1141_s1 }
  0x3e   :  { %p1148_p2 = por %p1147_p1, %p1146_p0 }
  0x40   :  { %p1149_p3 = pnand %p1148_p2, %p1142_p13 }
  0x42   :  { %1152 = shalt.err (!%p1149_p3)
}
  0x43   :  { %67 = dma.hbm_to_vmem [thread:$0]  %s1375_s5, 1024, %s1268_s30, [#allocation9], %s1185_s13, %s1185_s13, %s1186_s14  }
  0x44   :  { %1175 = dma.done.wait [#allocation3], 1024  }
  0x45   :  { %1176 = vsyncadd [#allocation3], 4294966272 }
  0x46   :  { %1177 = dma.done.wait [#allocation6], 2048  }
  0x47   :  { %1178 = vsyncadd [#allocation6], 4294965248 }
  0x48   :  { %1179 = dma.done.wait [#allocation9], 1024  }
  0x49   :  { %1180 = vsyncadd [#allocation9], 4294966272  ;;  %v1033_v0 = vld [vmem:[#allocation5] sm:$0xff]   ;;  %v1034_v1 = vld [vmem:[#allocation5 + $0x8] sm:$0xff]   ;;  %v320_v30 = vlaneseq  ;;  %v1189_v45 = vmov 0  }
  0x4a   :  { %913 = vmatprep.subr.bf16.mxu0 %v1033_v0  ;;  %v1035_v2 = vld [vmem:[#allocation5 + $0x10] sm:$0xff]   ;;  %v1036_v3 = vld [vmem:[#allocation5 + $0x18] sm:$0xff]   ;;  %v1041_v4 = vld [vmem:[#allocation2] sm:$0xff]  }
  0x4b   :  { %914 = vmatpush3.bf16.msra.mxu0 %v1033_v0  ;;  %929 = vmatprep.mubr.bf16.mxu0 %v1041_v4  ;;  %v1037_v5 = vld [vmem:[#allocation5 + $0x20] sm:$0xff]   ;;  %v1038_v6 = vld [vmem:[#allocation5 + $0x28] sm:$0xff]   ;;  %v1039_v9 = vld [vmem:[#allocation5 + $0x30] sm:$0xff]   ;;  %v321_v31 = vshrl.u32 %v320_v30, 7 }
  0x4c   :  { %915 = vmatprep.subr.bf16.mxu0 %v1034_v1  ;;  %v1049_v7 = vld [vmem:[#allocation7] sm:$0xff]   ;;  %v1050_v8 = vld [vmem:[#allocation7 + $0x8] sm:$0xff]   ;;  %v1051_v10 = vld [vmem:[#allocation7 + $0x10] sm:$0xff]  }
  0x4d   :  { %945 = vmatprep.subr.bf16.mxu1 %v1049_v7  ;;  %v1040_v11 = vld [vmem:[#allocation5 + $0x38] sm:$0xff]   ;;  %v1053_v13 = vld [vmem:[#allocation7 + $0x20] sm:$0xff]   ;;  %v1042_v14 = vld [vmem:[#allocation2 + $0x8] sm:$0xff]   ;;  %v1316_v34 = vsub.s32 0, %v321_v31 }
  0x4e   :  { %946 = vmatpush3.bf16.msra.mxu1 %v1049_v7  ;;  %v1052_v12 = vld [vmem:[#allocation7 + $0x18] sm:$0xff]   ;;  %v1043_v15 = vld [vmem:[#allocation2 + $0x10] sm:$0xff]   ;;  %v1054_v16 = vld [vmem:[#allocation7 + $0x28] sm:$0xff]  }
  0x4f   :  { %916 = vmatpush3.bf16.msra.mxu0 %v1034_v1  ;;  %947 = vmatprep.subr.bf16.mxu1 %v1050_v8  ;;  %v1044_v17 = vld [vmem:[#allocation2 + $0x18] sm:$0xff]   ;;  %v1045_v18 = vld [vmem:[#allocation2 + $0x20] sm:$0xff]   ;;  %v1046_v19 = vld [vmem:[#allocation2 + $0x28] sm:$0xff]  }
  0x50   :  { %917 = vmatprep.subr.bf16.mxu0 %v1035_v2  ;;  %v1047_v20 = vld [vmem:[#allocation2 + $0x30] sm:$0xff]   ;;  %v1048_v21 = vld [vmem:[#allocation2 + $0x38] sm:$0xff]   ;;  %v1057_v24 = vld [vmem:[#allocation8] sm:$0xff]  }
  0x51   :  { %v1055_v22 = vld [vmem:[#allocation7 + $0x30] sm:$0xff]   ;;  %v1056_v23 = vld [vmem:[#allocation7 + $0x38] sm:$0xff]   ;;  %v1058_v25 = vld [vmem:[#allocation8 + $0x8] sm:$0xff]  }
  0x52   :  { %948 = vmatpush3.bf16.msra.mxu1 %v1050_v8  ;;  %v1059_v26 = vld [vmem:[#allocation8 + $0x10] sm:$0xff]   ;;  %v1060_v27 = vld [vmem:[#allocation8 + $0x18] sm:$0xff]   ;;  %v1305_v28 = vld [vmem:[#allocation8 + $0x20] sm:$0xff]  }
  0x53   :  { %918 = vmatpush3.bf16.msra.mxu0 %v1035_v2  ;;  %949 = vmatprep.subr.bf16.mxu1 %v1051_v10  ;;  %v1308_v29 = vld [vmem:[#allocation8 + $0x28] sm:$0xff]   ;;  %v316_v32 = vld [vmem:[%s1372_s2] sm:$0x1] }
  0x54   :  { %919 = vmatprep.subr.bf16.mxu0 %v1036_v3  ;;  %v318_v33 = vpack.i.b16 %v316_v32, %v316_v32 }
  0x56   :  { %950 = vmatpush3.bf16.msra.mxu1 %v1051_v10  ;;  %v323_v37 = vrot.slane %v318_v33, %v1316_v34 }
  0x57   :  { %920 = vmatpush3.bf16.msra.mxu0 %v1036_v3  ;;  %951 = vmatprep.subr.bf16.mxu1 %v1052_v12 }
  0x58   :  { %921 = vmatprep.subr.bf16.mxu0 %v1037_v5 }
  0x5a   :  { %952 = vmatpush3.bf16.msra.mxu1 %v1052_v12 }
  0x5b   :  { %922 = vmatpush3.bf16.msra.mxu0 %v1037_v5  ;;  %953 = vmatprep.subr.bf16.mxu1 %v1053_v13 }
  0x5c   :  { %923 = vmatprep.subr.bf16.mxu0 %v1038_v6 }
  0x5e   :  { %954 = vmatpush3.bf16.msra.mxu1 %v1053_v13  ;;  %v1063_v13 = vld [vmem:[#allocation8 + $0x30] sm:$0xff]  }
  0x5f   :  { %924 = vmatpush3.bf16.msra.mxu0 %v1038_v6  ;;  %955 = vmatprep.subr.bf16.mxu1 %v1054_v16 }
  0x60   :  { %925 = vmatprep.subr.bf16.mxu0 %v1039_v9 }
  0x62   :  { %956 = vmatpush3.bf16.msra.mxu1 %v1054_v16 }
  0x63   :  { %926 = vmatpush3.bf16.msra.mxu0 %v1039_v9  ;;  %957 = vmatprep.subr.bf16.mxu1 %v1055_v22 }
  0x64   :  { %927 = vmatprep.subr.bf16.mxu0 %v1040_v11 }
  0x66   :  { %958 = vmatpush3.bf16.msra.mxu1 %v1055_v22 }
  0x67   :  { %928 = vmatpush3.bf16.msra.mxu0 %v1040_v11  ;;  %959 = vmatprep.subr.bf16.mxu1 %v1056_v23 }
  0x68   :  { %977 = vmatprep.subr.bf16.mxu0 %v1057_v24 }
  0x6a   :  { %930 = vmatmul.mubr.bf16.vlgmr.msra.gmra.mrb[0].mxu0 %v1042_v14  ;;  %960 = vmatpush3.bf16.msra.mxu1 %v1056_v23  ;;  %v1064_v14 = vld [vmem:[#allocation8 + $0x38] sm:$0xff]  }
  0x6b   :  { %933 = vmatprep.mubr.bf16.mxu0 %v1043_v15  ;;  %1009 = vmatprep.subr.bf16.mxu1 %v1057_v24  ;;  %v509_v15 = vld [vmem:[%s1374_s4] sm:$0x1] }
  0x6c   :  { %978 = vmatpush3.bf16.msra.mxu0 %v1057_v24  ;;  %v511_v16 = vpack.i.b16 %v509_v15, %v509_v15 }
  0x6d   :  { %979 = vmatprep.subr.bf16.mxu0 %v1058_v25 }
  0x70   :  { %980 = vmatpush3.bf16.msra.mxu0 %v1058_v25 }
  0x71   :  { %981 = vmatprep.subr.bf16.mxu0 %v1059_v26 }
  0x72   :  { %934 = vmatmul.mubr.bf16.gmra.mrb[4].mxu0 %v1044_v17 }
  0x73   :  { %937 = vmatprep.mubr.bf16.mxu0 %v1045_v18 }
  0x74   :  { %982 = vmatpush3.bf16.msra.mxu0 %v1059_v26 }
  0x75   :  { %983 = vmatprep.subr.bf16.mxu0 %v1060_v27 }
  0x78   :  { %984 = vmatpush3.bf16.msra.mxu0 %v1060_v27 }
  0x79   :  { %985 = vmatprep.subr.bf16.mxu0 %v1305_v28 }
  0x7a   :  { %938 = vmatmul.mubr.bf16.gmra.mrb[8].mxu0 %v1046_v19  ;;  %v516_v19 = vrot.slane %v511_v16, %v1316_v34 }
  0x7b   :  { %941 = vmatprep.mubr.bf16.mxu0 %v1047_v20 }
  0x7c   :  { %986 = vmatpush3.bf16.msra.mxu0 %v1305_v28 }
  0x7d   :  { %987 = vmatprep.subr.bf16.mxu0 %v1308_v29 }
  0x80   :  { %988 = vmatpush3.bf16.msra.mxu0 %v1308_v29 }
  0x81   :  { %989 = vmatprep.subr.bf16.mxu0 %v1063_v13 }
  0x82   :  { %942 = vmatmul.mubr.bf16.gmra.mrb[12].mxu0 %v1048_v21 }
  0x84   :  { %990 = vmatpush3.bf16.msra.mxu0 %v1063_v13 }
  0x85   :  { %991 = vmatprep.subr.bf16.mxu0 %v1064_v14 }
  0x88   :  { %992 = vmatpush3.bf16.msra.mxu0 %v1064_v14 }
 0x13d   :  { %v931_v35 = vpop.f32.mrb[0].mxu0 }
 0x13e   :  { %v245_v36 = vpop.f32.mrb[1].mxu0 }
 0x13f   :  { %v932_v38 = vpop.f32.mrb[2].mxu0 }
 0x140   :  { %v309_v39 = vpack.c.bf16 %v932_v38, %v931_v35  ;;  %v248_v40 = vpop.f32.mrb[3].mxu0 }
 0x141   :  { %v308_v41 = vpack.c.bf16 %v248_v40, %v245_v36 }
 0x142   :  { %v325_v42 = vadd.bf16 %v323_v37, %v309_v39 }
 0x143   :  { %v324_v43 = vadd.bf16 %v323_v37, %v308_v41 }
 0x144   :  { %v333_v48 = vmax.bf16 %v1189_v45, %v325_v42 }
 0x145   :  { %v935_v44 = vpop.f32.mrb[4].mxu0  ;;  %v332_v46 = vmax.bf16 %v1189_v45, %v324_v43 }
 0x146   :  { %v261_v47 = vpop.f32.mrb[5].mxu0 }
 0x147   :  { %v936_v49 = vpop.f32.mrb[6].mxu0  ;;  %961 = vmatprep.mubr.bf16.mxu1 %v332_v46 }
 0x148   :  { %v311_v50 = vpack.c.bf16 %v936_v49, %v935_v44  ;;  %v264_v51 = vpop.f32.mrb[7].mxu0  ;;  %962 = vmatmul.mubr.bf16.vlgmr.msra.gmra.mrb[0].mxu1 %v333_v48 }
 0x149   :  { %v310_v52 = vpack.c.bf16 %v264_v51, %v261_v47  ;;  %1017 = vmatpush3.bf16.msra.mxu1 %v1057_v24 }
 0x14a   :  { %v327_v53 = vadd.bf16 %v323_v37, %v311_v50  ;;  %1010 = vmatprep.subr.bf16.mxu1 %v1058_v25 }
 0x14b   :  { %v326_v54 = vadd.bf16 %v323_v37, %v310_v52 }
 0x14c   :  { %v335_v58 = vmax.bf16 %v1189_v45, %v327_v53 }
 0x14d   :  { %v939_v55 = vpop.f32.mrb[8].mxu0  ;;  %v334_v56 = vmax.bf16 %v1189_v45, %v326_v54  ;;  %1018 = vmatpush3.bf16.msra.mxu1 %v1058_v25 }
 0x14e   :  { %v277_v57 = vpop.f32.mrb[9].mxu0  ;;  %1011 = vmatprep.subr.bf16.mxu1 %v1059_v26 }
 0x14f   :  { %v940_v59 = vpop.f32.mrb[10].mxu0  ;;  %965 = vmatprep.mubr.bf16.mxu1 %v334_v56 }
 0x150   :  { %v313_v60 = vpack.c.bf16 %v940_v59, %v939_v55  ;;  %v280_v61 = vpop.f32.mrb[11].mxu0  ;;  %966 = vmatmul.mubr.bf16.gmra.mrb[4].mxu1 %v335_v58 }
 0x151   :  { %v312_v62 = vpack.c.bf16 %v280_v61, %v277_v57  ;;  %1019 = vmatpush3.bf16.msra.mxu1 %v1059_v26 }
 0x152   :  { %v329_v63 = vadd.bf16 %v323_v37, %v313_v60  ;;  %1012 = vmatprep.subr.bf16.mxu1 %v1060_v27  ;;  %v702_v60 = vld [vmem:[%s1376_s6] sm:$0x1]  ;;  %s1190_s6 = smov [#allocation10]  }
 0x153   :  { %v328_v0 = vadd.bf16 %v323_v37, %v312_v62  ;;  %v704_v61 = vpack.i.b16 %v702_v60, %v702_v60  ;;  %s803_s30 = sshll.u32 %s1190_s6, 4  ;;  %s804_s30 = int_to_ptr.vmem [resolvable:$true] %s803_s30 }
 0x154   :  { %v337_v4 = vmax.bf16 %v1189_v45, %v329_v63  ;;  %s1153_s8 = scalar_lea.vmem %s804_s30, 1024  ;;  %p1158_p5 = scmp.lt.s32.totalorder %s804_s30, %s804_s30 }
 0x155   :  { %v943_v1 = vpop.f32.mrb[12].mxu0  ;;  %v336_v2 = vmax.bf16 %v1189_v45, %v328_v0  ;;  %1020 = vmatpush3.bf16.msra.mxu1 %v1060_v27  ;;  %v709_v0 = vrot.slane %v704_v61, %v1316_v34  ;;  %p1154_p4 = scmp.ne.s32.totalorder %s804_s30, %s1153_s8  ;;  %p1159_p6 = scmp.lt.s32.totalorder %s1153_s8, %s1153_s8 }
 0x156   :  { %v293_v3 = vpop.f32.mrb[13].mxu0  ;;  %1013 = vmatprep.subr.bf16.mxu1 %v1305_v28 }
 0x157   :  { %v944_v5 = vpop.f32.mrb[14].mxu0  ;;  %969 = vmatprep.mubr.bf16.mxu1 %v336_v2  ;;  %p1160_p7 = por %p1159_p6, %p1158_p5 }
 0x158   :  { %v315_v6 = vpack.c.bf16 %v944_v5, %v943_v1  ;;  %v296_v7 = vpop.f32.mrb[15].mxu0  ;;  %970 = vmatmul.mubr.bf16.gmra.mrb[8].mxu1 %v337_v4 }
 0x159   :  { %v314_v8 = vpack.c.bf16 %v296_v7, %v293_v3  ;;  %1021 = vmatpush3.bf16.msra.mxu1 %v1305_v28  ;;  %p1161_p8 = pnand %p1160_p7, %p1154_p4 }
 0x15a   :  { %v331_v9 = vadd.bf16 %v323_v37, %v315_v6  ;;  %1014 = vmatprep.subr.bf16.mxu1 %v1308_v29 }
 0x15b   :  { %v330_v10 = vadd.bf16 %v323_v37, %v314_v8 }
 0x15c   :  { %v339_v12 = vmax.bf16 %v1189_v45, %v331_v9 }
 0x15d   :  { %v338_v11 = vmax.bf16 %v1189_v45, %v330_v10  ;;  %1022 = vmatpush3.bf16.msra.mxu1 %v1308_v29 }
 0x15e   :  { %1015 = vmatprep.subr.bf16.mxu1 %v1063_v13 }
 0x15f   :  { %973 = vmatprep.mubr.bf16.mxu1 %v338_v11 }
 0x160   :  { %974 = vmatmul.mubr.bf16.gmra.mrb[12].mxu1 %v339_v12 }
 0x161   :  { %1023 = vmatpush3.bf16.msra.mxu1 %v1063_v13 }
 0x162   :  { %1016 = vmatprep.subr.bf16.mxu1 %v1064_v14 }
 0x165   :  { %1024 = vmatpush3.bf16.msra.mxu1 %v1064_v14 }
 0x21b   :  { %v963_v17 = vpop.f32.mrb[0].mxu1 }
 0x21c   :  { %v438_v18 = vpop.f32.mrb[1].mxu1 }
 0x21d   :  { %v964_v20 = vpop.f32.mrb[2].mxu1 }
 0x21e   :  { %v502_v21 = vpack.c.bf16 %v964_v20, %v963_v17  ;;  %v441_v22 = vpop.f32.mrb[3].mxu1 }
 0x21f   :  { %v501_v23 = vpack.c.bf16 %v441_v22, %v438_v18 }
 0x220   :  { %v518_v24 = vadd.bf16 %v516_v19, %v502_v21 }
 0x221   :  { %v517_v25 = vadd.bf16 %v516_v19, %v501_v23 }
 0x222   :  { %v526_v28 = vmax.bf16 %v1189_v45, %v518_v24 }
 0x223   :  { %v967_v26 = vpop.f32.mrb[4].mxu1  ;;  %v525_v27 = vmax.bf16 %v1189_v45, %v517_v25 }
 0x224   :  { %v454_v29 = vpop.f32.mrb[5].mxu1 }
 0x225   :  { %v968_v30 = vpop.f32.mrb[6].mxu1  ;;  %993 = vmatprep.mubr.bf16.mxu0 %v525_v27 }
 0x226   :  { %v504_v31 = vpack.c.bf16 %v968_v30, %v967_v26  ;;  %v457_v32 = vpop.f32.mrb[7].mxu1  ;;  %994 = vmatmul.mubr.bf16.vlgmr.msra.gmra.mrb[16].mxu0 %v526_v28 }
 0x227   :  { %v503_v33 = vpack.c.bf16 %v457_v32, %v454_v29 }
 0x228   :  { %v520_v35 = vadd.bf16 %v516_v19, %v504_v31 }
 0x229   :  { %v519_v36 = vadd.bf16 %v516_v19, %v503_v33 }
 0x22a   :  { %v528_v40 = vmax.bf16 %v1189_v45, %v520_v35 }
 0x22b   :  { %v971_v37 = vpop.f32.mrb[8].mxu1  ;;  %v527_v38 = vmax.bf16 %v1189_v45, %v519_v36 }
 0x22c   :  { %v470_v39 = vpop.f32.mrb[9].mxu1 }
 0x22d   :  { %v972_v41 = vpop.f32.mrb[10].mxu1  ;;  %997 = vmatprep.mubr.bf16.mxu0 %v527_v38 }
 0x22e   :  { %v506_v42 = vpack.c.bf16 %v972_v41, %v971_v37  ;;  %v473_v43 = vpop.f32.mrb[11].mxu1  ;;  %998 = vmatmul.mubr.bf16.gmra.mrb[20].mxu0 %v528_v40 }
 0x22f   :  { %v505_v44 = vpack.c.bf16 %v473_v43, %v470_v39 }
 0x230   :  { %v522_v46 = vadd.bf16 %v516_v19, %v506_v42 }
 0x231   :  { %v521_v47 = vadd.bf16 %v516_v19, %v505_v44 }
 0x232   :  { %v530_v50 = vmax.bf16 %v1189_v45, %v522_v46 }
 0x233   :  { %v975_v48 = vpop.f32.mrb[12].mxu1  ;;  %v529_v49 = vmax.bf16 %v1189_v45, %v521_v47 }
 0x234   :  { %v486_v51 = vpop.f32.mrb[13].mxu1 }
 0x235   :  { %v976_v52 = vpop.f32.mrb[14].mxu1  ;;  %1001 = vmatprep.mubr.bf16.mxu1 %v529_v49 }
 0x236   :  { %v508_v53 = vpack.c.bf16 %v976_v52, %v975_v48  ;;  %v489_v54 = vpop.f32.mrb[15].mxu1  ;;  %1002 = vmatmul.mubr.bf16.vlgmr.msra.gmra.mrb[16].mxu1 %v530_v50 }
 0x237   :  { %v507_v55 = vpack.c.bf16 %v489_v54, %v486_v51 }
 0x238   :  { %v524_v56 = vadd.bf16 %v516_v19, %v508_v53 }
 0x239   :  { %v523_v57 = vadd.bf16 %v516_v19, %v507_v55 }
 0x23a   :  { %v532_v59 = vmax.bf16 %v1189_v45, %v524_v56 }
 0x23b   :  { %v531_v58 = vmax.bf16 %v1189_v45, %v523_v57 }
 0x23d   :  { %1005 = vmatprep.mubr.bf16.mxu1 %v531_v58 }
 0x23e   :  { %1006 = vmatmul.mubr.bf16.gmra.mrb[20].mxu1 %v532_v59 }
 0x2f9   :  { %v995_v62 = vpop.f32.mrb[16].mxu0 }
 0x2fa   :  { %v631_v63 = vpop.f32.mrb[17].mxu0 }
 0x2fb   :  { %v996_v1 = vpop.f32.mrb[18].mxu0 }
 0x2fc   :  { %v695_v2 = vpack.c.bf16 %v996_v1, %v995_v62  ;;  %v634_v3 = vpop.f32.mrb[19].mxu0 }
 0x2fd   :  { %v694_v4 = vpack.c.bf16 %v634_v3, %v631_v63 }
 0x2fe   :  { %v711_v5 = vadd.bf16 %v709_v0, %v695_v2 }
 0x2ff   :  { %v710_v6 = vadd.bf16 %v709_v0, %v694_v4 }
 0x300   :  { %v719_v7 = vmax.bf16 %v1189_v45, %v711_v5 }
 0x301   :  { %v718_v8 = vmax.bf16 %v1189_v45, %v710_v6  ;;  %v999_v9 = vpop.f32.mrb[20].mxu0 }
 0x302   :  { %v851_v10 = vcombine.low %v719_v7, %v719_v7  ;;  %v852_v11 = vcombine.high %v719_v7, %v719_v7  ;;  %v647_v12 = vpop.f32.mrb[21].mxu0 }
 0x303   :  { %v849_v13 = vcombine.low %v718_v8, %v718_v8  ;;  %v850_v14 = vcombine.high %v718_v8, %v718_v8  ;;  %v1000_v15 = vpop.f32.mrb[22].mxu0 }
 0x304   :  { %784 = vst [vmem:[#allocation10 + $0x8] sm:$0xf] %v851_v10  ;;  %785 = vst [vmem:[#allocation10 + $0xc] sm:$0xf] %v852_v11  ;;  %v697_v34 = vpack.c.bf16 %v1000_v15, %v999_v9  ;;  %v650_v16 = vpop.f32.mrb[23].mxu0 }
 0x305   :  { %782 = vst [vmem:[#allocation10] sm:$0xf] %v849_v13  ;;  %783 = vst [vmem:[#allocation10 + $0x4] sm:$0xf] %v850_v14  ;;  %v696_v17 = vpack.c.bf16 %v650_v16, %v647_v12 }
 0x306   :  { %v713_v18 = vadd.bf16 %v709_v0, %v697_v34 }
 0x307   :  { %v712_v19 = vadd.bf16 %v709_v0, %v696_v17 }
 0x308   :  { %v721_v20 = vmax.bf16 %v1189_v45, %v713_v18 }
 0x309   :  { %v720_v21 = vmax.bf16 %v1189_v45, %v712_v19  ;;  %v1003_v22 = vpop.f32.mrb[16].mxu1 }
 0x30a   :  { %v855_v23 = vcombine.low %v721_v20, %v721_v20  ;;  %v856_v24 = vcombine.high %v721_v20, %v721_v20  ;;  %v663_v25 = vpop.f32.mrb[17].mxu1 }
 0x30b   :  { %v853_v26 = vcombine.low %v720_v21, %v720_v21  ;;  %v854_v27 = vcombine.high %v720_v21, %v720_v21  ;;  %v1004_v28 = vpop.f32.mrb[18].mxu1 }
 0x30c   :  { %788 = vst [vmem:[#allocation10 + $0x18] sm:$0xf] %v855_v23  ;;  %789 = vst [vmem:[#allocation10 + $0x1c] sm:$0xf] %v856_v24  ;;  %v699_v29 = vpack.c.bf16 %v1004_v28, %v1003_v22  ;;  %v666_v30 = vpop.f32.mrb[19].mxu1 }
 0x30d   :  { %786 = vst [vmem:[#allocation10 + $0x10] sm:$0xf] %v853_v26  ;;  %787 = vst [vmem:[#allocation10 + $0x14] sm:$0xf] %v854_v27  ;;  %v698_v31 = vpack.c.bf16 %v666_v30, %v663_v25 }
 0x30e   :  { %v715_v32 = vadd.bf16 %v709_v0, %v699_v29 }
 0x30f   :  { %v714_v33 = vadd.bf16 %v709_v0, %v698_v31 }
 0x310   :  { %v723_v35 = vmax.bf16 %v1189_v45, %v715_v32 }
 0x311   :  { %v722_v36 = vmax.bf16 %v1189_v45, %v714_v33  ;;  %v1007_v37 = vpop.f32.mrb[20].mxu1 }
 0x312   :  { %v859_v38 = vcombine.low %v723_v35, %v723_v35  ;;  %v860_v39 = vcombine.high %v723_v35, %v723_v35  ;;  %v679_v40 = vpop.f32.mrb[21].mxu1 }
 0x313   :  { %v857_v41 = vcombine.low %v722_v36, %v722_v36  ;;  %v858_v42 = vcombine.high %v722_v36, %v722_v36  ;;  %v1008_v43 = vpop.f32.mrb[22].mxu1 }
 0x314   :  { %792 = vst [vmem:[#allocation10 + $0x28] sm:$0xf] %v859_v38  ;;  %793 = vst [vmem:[#allocation10 + $0x2c] sm:$0xf] %v860_v39  ;;  %v701_v44 = vpack.c.bf16 %v1008_v43, %v1007_v37  ;;  %v682_v46 = vpop.f32.mrb[23].mxu1 }
 0x315   :  { %790 = vst [vmem:[#allocation10 + $0x20] sm:$0xf] %v857_v41  ;;  %791 = vst [vmem:[#allocation10 + $0x24] sm:$0xf] %v858_v42  ;;  %v700_v47 = vpack.c.bf16 %v682_v46, %v679_v40 }
 0x316   :  { %v717_v48 = vadd.bf16 %v709_v0, %v701_v44 }
 0x317   :  { %v716_v49 = vadd.bf16 %v709_v0, %v700_v47 }
 0x318   :  { %v725_v50 = vmax.bf16 %v1189_v45, %v717_v48 }
 0x319   :  { %v724_v51 = vmax.bf16 %v1189_v45, %v716_v49 }
 0x31a   :  { %v863_v52 = vcombine.low %v725_v50, %v725_v50  ;;  %v864_v53 = vcombine.high %v725_v50, %v725_v50 }
 0x31b   :  { %v861_v54 = vcombine.low %v724_v51, %v724_v51  ;;  %v862_v55 = vcombine.high %v724_v51, %v724_v51 }
 0x31c   :  { %796 = vst [vmem:[#allocation10 + $0x38] sm:$0xf] %v863_v52  ;;  %797 = vst [vmem:[#allocation10 + $0x3c] sm:$0xf] %v864_v53 }
 0x31d   :  { %794 = vst [vmem:[#allocation10 + $0x30] sm:$0xf] %v861_v54  ;;  %795 = vst [vmem:[#allocation10 + $0x34] sm:$0xf] %v862_v55 }
 0x31e   :  { %1164 = shalt.err (!%p1161_p8)
}
 0x31f   :  { %s1165_s11 = scalar_lea.hbm %s1377_s7, 1024 }
 0x320   :  { %p1166_p9 = scmp.ne.s32.totalorder %s1377_s7, %s1165_s11  ;;  %p1169_p10 = scmp.lt.u32.totalorder %s1165_s11, %s1377_s7 }
 0x322   :  { %p1171_p11 = pnand %p1169_p10, %p1166_p9 }
 0x324   :  { %1174 = shalt.err (!%p1171_p11)
}
 0x325   :  { %809 = dma.vmem_to_hbm [thread:$0]  %s804_s30, 1024, %s1377_s7, [#allocation4], %s1185_s13, %s1185_s13, %s1186_s14  }
 0x326   :  { %1181 = dma.done.wait [#allocation4], 1024  }
 0x327   :  { %1182 = vsyncadd [#allocation4], 4294966272 }
 0x328   :  { %813 = vsyncpa [#allocation3], 1 }
 0x329   :  { %814 = vsyncpa [#allocation6], 1 }
 0x32a   :  { %815 = vsyncpa [#allocation9], 1 }
 0x32b   :  { %816 = vsyncpa [#allocation4], 1 }

</bundles_post_ra>
